<compile_context>
chip_gen: v7x
topology: tpu7x:2x2x1
jax: 0.10.0
libtpu: 0.0.40
codegen_flags: <defaults>
</compile_context>

<pallas_src>
import functools

import jax
import jax.numpy as jnp
from jax.experimental import pallas as pl
from jax.experimental.pallas import tpu as pltpu

LANES = 128            # vreg lane width (last dim)
SUBLANES = 8           # f32 sublane pack; accumulator rows
DEFAULT_TILE_M = 2048  # rows per grid step (1 MiB f32 per input per buffer)
NUM_SPLITS = 2         # leading "parallel" axis -> both TCs on v7x; no-op cost on v5e/v6e


def _round_up(x, n):
    return (x + n - 1) // n * n


def _bce_kernel(pred_ref, tgt_ref, out_ref, acc_ref, *,
                total_elems, tile_m, steps_per_core, needs_mask):
    i = pl.program_id(1)  # reduction ("arbitrary") axis

    @pl.when(i == 0)
    def _():
        acc_ref[...] = jnp.zeros_like(acc_ref)

    # Stream in native dtype, widen on the VPU.
    p = pred_ref[...].astype(jnp.float32)
    t = tgt_ref[...].astype(jnp.float32)
    # Elementwise BCE term (sign convention matches the PyTorch module as written).
    val = t * jnp.log(p) + (1.0 - t) * jnp.log(1.0 - p)

    if needs_mask:
        # Zero the padded tail (padding values were chosen so the logs stay finite).
        row0 = (pl.program_id(0) * steps_per_core + i) * tile_m
        rows = row0 + jax.lax.broadcasted_iota(jnp.int32, (tile_m, LANES), 0)
        lanes = jax.lax.broadcasted_iota(jnp.int32, (tile_m, LANES), 1)
        val = jnp.where(rows * LANES + lanes < total_elems, val, 0.0)

    # Partial reduction: fold vreg groups together with pure elementwise VPU adds,
    # keeping a vreg-shaped (8, 128) running accumulator. The expensive XLU
    # cross-sublane/cross-lane reduce is deferred to the tiny wrapper-side sum.
    acc_ref[...] += val.reshape(tile_m // SUBLANES, SUBLANES, LANES).sum(axis=0)

    @pl.when(i == steps_per_core - 1)
    def _():
        out_ref[...] = acc_ref[...]


def loss_bce_pallas(pred, target, *, tile_m=DEFAULT_TILE_M):
    """Computes (target*log(pred) + (1-target)*log(1-pred)).mean() on TPU."""
    assert pred.shape == target.shape
    total = int(pred.size)
    itemsize = jnp.dtype(pred.dtype).itemsize
    # Sub-32-bit dtypes pack along sublanes: 8 rows for f32, 16 for bf16, 32 for 8-bit.
    pack = SUBLANES * max(1, 4 // itemsize)

    m = pl.cdiv(total, LANES)                 # lane-dense rows needed
    rows_per_core = pl.cdiv(m, NUM_SPLITS)
    tm = min(tile_m, _round_up(rows_per_core, pack))
    tm = _round_up(tm, pack)
    steps = pl.cdiv(rows_per_core, tm)
    m_pad = NUM_SPLITS * steps * tm
    padded_total = m_pad * LANES
    needs_mask = padded_total != total

    flat_p = pred.reshape(-1)
    flat_t = target.reshape(-1)
    if needs_mask:
        pad = padded_total - total
        # pred padded with 0.5 keeps log(p)/log(1-p) finite; masked to zero in-kernel.
        flat_p = jnp.concatenate([flat_p, jnp.full((pad,), 0.5, dtype=flat_p.dtype)])
        flat_t = jnp.concatenate([flat_t, jnp.zeros((pad,), dtype=flat_t.dtype)])
    pred2d = flat_p.reshape(m_pad, LANES)
    tgt2d = flat_t.reshape(m_pad, LANES)

    kernel = functools.partial(
        _bce_kernel, total_elems=total, tile_m=tm,
        steps_per_core=steps, needs_mask=needs_mask)

    partials = pl.pallas_call(
        kernel,
        out_shape=jax.ShapeDtypeStruct((NUM_SPLITS * SUBLANES, LANES), jnp.float32),
        grid_spec=pltpu.PrefetchScalarGridSpec(
            num_scalar_prefetch=0,
            grid=(NUM_SPLITS, steps),
            in_specs=[
                pl.BlockSpec((tm, LANES), lambda c, i: (c * steps + i, 0)),
                pl.BlockSpec((tm, LANES), lambda c, i: (c * steps + i, 0)),
            ],
            out_specs=pl.BlockSpec((SUBLANES, LANES), lambda c, i: (c, 0)),
            scratch_shapes=[pltpu.VMEM((SUBLANES, LANES), jnp.float32)],
        ),
        compiler_params=pltpu.CompilerParams(
            dimension_semantics=("parallel", "arbitrary"),
        ),
    )(pred2d, tgt2d)

    # Single tiny cross-lane reduce + mean normalization outside the hot loop.
    return jnp.sum(partials) / jnp.float32(total)


if __name__ == "__main__":
    key = jax.random.PRNGKey(0)
    k1, k2 = jax.random.split(key)

    B, C, H, W = 2, 4, 16, 16  # NCHW, as in PyTorch convention
    # pred strictly in (0, 1) (module assumes probabilities), target in {0, 1}.
    pred = jax.nn.sigmoid(jax.random.normal(k1, (B, C, H, W), dtype=jnp.float32))
    target = jnp.round(
        jax.random.uniform(k2, (B, C, H, W), dtype=jnp.float32)
    )

    loss = loss_bce_pallas(pred, target)
    loss = jax.block_until_ready(loss)

    # Pure-JAX reference check.
    ref = jnp.mean(target * jnp.log(pred) + (1.0 - target) * jnp.log(1.0 - pred))
    assert jnp.allclose(loss, ref, rtol=1e-5, atol=1e-6), (loss, ref)

    print("KERNEL_OK")
</pallas_src>

<mosaic_0001>
module attributes {stable_mosaic.version = 11 : i64} {
  func.func @_bce_kernel(%arg0: i32, %arg1: i32, %arg2: memref<8x128xf32, #tpu.memory_space<vmem>>, %arg3: memref<8x128xf32, #tpu.memory_space<vmem>>, %arg4: memref<8x128xf32, #tpu.memory_space<vmem>>, %arg5: memref<8x128xf32, #tpu.memory_space<vmem>>) attributes {dimension_semantics = [#tpu.dimension_semantics<parallel>, #tpu.dimension_semantics<arbitrary>], iteration_bounds = array<i64: 2, 1>, scalar_prefetch = 0 : i64, scratch_operands = 1 : i64, tpu.core_type = #tpu.core_type<tc>, window_params = [{transform_indices = @transform_0, window_bounds = array<i64: 8, 128>}, {transform_indices = @transform_1, window_bounds = array<i64: 8, 128>}, {transform_indices = @transform_2, window_bounds = array<i64: 8, 128>}]} {
    %c0_i32 = arith.constant 0 : i32
    %0 = arith.cmpi eq, %arg1, %c0_i32 : i32
    %1 = arith.extui %0 : i1 to i32
    %c0_i32_0 = arith.constant 0 : i32
    %2 = arith.cmpi ne, %1, %c0_i32_0 : i32
    scf.if %2 {
      %cst_12 = arith.constant 0.000000e+00 : f32
      %22 = vector.broadcast %cst_12 : f32 to vector<8x128xf32>
      %c0_13 = arith.constant 0 : index
      %c0_14 = arith.constant 0 : index
      %23 = vector.load %arg5[%c0_13, %c0_14] : memref<8x128xf32, #tpu.memory_space<vmem>>, vector<8x128xf32>
      tpu.vector_store %arg5[%c0_13, %c0_14], %22 {strides = array<i32>} : memref<8x128xf32, #tpu.memory_space<vmem>>, vector<8x128xf32>,
    } else {
    }
    %c0 = arith.constant 0 : index
    %c0_1 = arith.constant 0 : index
    %3 = vector.load %arg2[%c0, %c0_1] : memref<8x128xf32, #tpu.memory_space<vmem>>, vector<8x128xf32>
    %c0_2 = arith.constant 0 : index
    %c0_3 = arith.constant 0 : index
    %4 = vector.load %arg3[%c0_2, %c0_3] : memref<8x128xf32, #tpu.memory_space<vmem>>, vector<8x128xf32>
    %5 = math.log %3 : vector<8x128xf32>
    %6 = arith.mulf %4, %5 : vector<8x128xf32>
    %cst = arith.constant 1.000000e+00 : f32
    %7 = vector.broadcast %cst : f32 to vector<8x128xf32>
    %8 = arith.subf %7, %4 : vector<8x128xf32>
    %cst_4 = arith.constant 1.000000e+00 : f32
    %9 = vector.broadcast %cst_4 : f32 to vector<8x128xf32>
    %10 = arith.subf %9, %3 : vector<8x128xf32>
    %11 = math.log %10 : vector<8x128xf32>
    %12 = arith.mulf %8, %11 : vector<8x128xf32>
    %13 = arith.addf %6, %12 : vector<8x128xf32>
    %c0_5 = arith.constant 0 : index
    %c0_6 = arith.constant 0 : index
    %14 = vector.load %arg5[%c0_5, %c0_6] : memref<8x128xf32, #tpu.memory_space<vmem>>, vector<8x128xf32>
    %15 = vector.shape_cast %13 : vector<8x128xf32> to vector<1x8x128xf32>
    %cst_7 = arith.constant dense<0.000000e+00> : vector<8x128xf32>
    %16 = vector.multi_reduction <add>, %15, %cst_7 [0] : vector<1x8x128xf32> to vector<8x128xf32>
    %17 = arith.addf %14, %16 : vector<8x128xf32>
    %c0_8 = arith.constant 0 : index
    %c0_9 = arith.constant 0 : index
    %18 = vector.load %arg5[%c0_8, %c0_9] : memref<8x128xf32, #tpu.memory_space<vmem>>, vector<8x128xf32>
    tpu.vector_store %arg5[%c0_8, %c0_9], %17 {strides = array<i32>} : memref<8x128xf32, #tpu.memory_space<vmem>>, vector<8x128xf32>,
    %c0_i32_10 = arith.constant 0 : i32
    %19 = arith.cmpi eq, %arg1, %c0_i32_10 : i32
    %20 = arith.extui %19 : i1 to i32
    %c0_i32_11 = arith.constant 0 : i32
    %21 = arith.cmpi ne, %20, %c0_i32_11 : i32
    scf.if %21 {
      %c0_12 = arith.constant 0 : index
      %c0_13 = arith.constant 0 : index
      %22 = vector.load %arg5[%c0_12, %c0_13] : memref<8x128xf32, #tpu.memory_space<vmem>>, vector<8x128xf32>
      %c0_14 = arith.constant 0 : index
      %c0_15 = arith.constant 0 : index
      %23 = vector.load %arg4[%c0_14, %c0_15] : memref<8x128xf32, #tpu.memory_space<vmem>>, vector<8x128xf32>
      tpu.vector_store %arg4[%c0_14, %c0_15], %22 {strides = array<i32>} : memref<8x128xf32, #tpu.memory_space<vmem>>, vector<8x128xf32>,
    } else {
    }
    return
  }
  func.func @transform_0(%arg0: i32, %arg1: i32) -> (i32, i32) {
    %c1_i32 = arith.constant 1 : i32
    %0 = arith.muli %arg0, %c1_i32 : i32
    %1 = arith.addi %0, %arg1 : i32
    %c0_i32 = arith.constant 0 : i32
    %c0_i32_0 = arith.constant 0 : i32
    return %1, %c0_i32 : i32, i32
  }
  func.func @transform_1(%arg0: i32, %arg1: i32) -> (i32, i32) {
    %c1_i32 = arith.constant 1 : i32
    %0 = arith.muli %arg0, %c1_i32 : i32
    %1 = arith.addi %0, %arg1 : i32
    %c0_i32 = arith.constant 0 : i32
    %c0_i32_0 = arith.constant 0 : i32
    return %1, %c0_i32 : i32, i32
  }
  func.func @transform_2(%arg0: i32, %arg1: i32) -> (i32, i32) {
    %c0_i32 = arith.constant 0 : i32
    %c0_i32_0 = arith.constant 0 : i32
    return %arg0, %c0_i32 : i32, i32
  }
}

</mosaic_0001>

<bundles_post_ra>
// kernel: tpu_custom_call.1
= control target key start
LH: loop header
LB: loop body
LE: loop exit
PB: predicated region body
PF: predicated region fallthrough
CT: control target
= control target key end

     0   :  { %7 = vsyncpa [#allocation4], 0  ;;  %s831_s0 = inlined_call_operand.hbm [shape: f32[16,128], index: 0, kind: input, shape index: {}]   ;;  %s832_s1 = inlined_call_operand.hbm [shape: f32[16,128], index: 1, kind: input, shape index: {}]   ;;  %s833_s2 = inlined_call_operand.hbm [shape: f32[16,128], index: 2, kind: output, shape index: {}]  }
   0x1   :  { %9 = vsyncpa [#allocation4 + $0x1], 0 }
   0x2   :  { %10 = vsyncpa [#allocation7], 0 }
   0x3   :  { %12 = vsyncpa [#allocation7 + $0x1], 0 }
   0x4   :  { %13 = vsyncpa [#allocation5], 0 }
   0x5   :  { %15 = vsyncpa [#allocation5 + $0x1], 0  ;;  %s611_s9 = smov 0   ;;  %s613_s10 = smov 0  }
   0x6   :  { %s615_s11 = smov 0   ;;  %s617_s12 = smov 0  }
   0x7   :  { %s619_s13 = smov 0   ;;  %s621_s14 = smov 0  }
   0x8 LB: > { %s358_s15 = sadd.s32 4294967295, %s591_s14   ;;  %s359_s16 = sadd.s32 4294967294, %s591_s14   ;;  %s591_s14 = sphi %s621_s14, %s21_s14   ;;  %s587_s13 = sphi %s619_s13, %s853_s13   ;;  %s583_s12 = sphi %s617_s12, %s852_s12   ;;  %s579_s11 = sphi %s615_s11, %s851_s11   ;;  %s575_s10 = sphi %s613_s10, %s850_s10   ;;  %s571_s9 = sphi %s611_s9, %s849_s9  }
   0x9   : > { %s33_s17 = sadd.s32 1, %s587_s13  ;;  %s42_s18 = sadd.s32 1, %s579_s11 }
   0xa   : > { %p35_p0 = scmp.ge.s32.totalorder %s33_s17, 2  ;;  %p49_p1 = scmp.ne.s32.totalorder %s579_s11, %s575_s10 }
   0xb   : > { %p50_p2 = scmp.eq.s32.totalorder %s591_s14, 0  ;;  %p55_p3 = scmp.ne.s32.totalorder %s575_s10, %s571_s9 }
   0xc   : > { %s855_s17 = smov (%p35_p0, %s33_s17), 0  ;;  %p56_p5 = scmp.eq.s32.totalorder %s358_s15, 0 }
   0xd   : > { %p652_p4 = por %p50_p2, %p49_p1  ;;  %s39_s20 = ssub.s32 %s587_s13, %s855_s17 }
   0xe   : > { %p107_p6 = scmp.eq.s32.totalorder %s358_s15, 1  ;;  %p40_p7 = scmp.eq.s32.totalorder %s39_s20, 0 }
   0xf   : > { %p658_p8 = por %p56_p5, %p55_p3  ;;  %p113_p10 = scmp.eq.s32.totalorder %s359_s16, 1 }
  0x10   : > { %p662_p9 = por %p107_p6, %p49_p1  ;;  %p391_p13 = scmp.lt.s32.totalorder %s591_s14, 2 }
  0x11   : > { %s837_s21 = scalar_select %p658_p8, 1, 0 }
  0x12   : > { %s838_s22 = scalar_select %p662_p9, 1, 0 }
  0x13   : > { %s667_s23 = scalar_select %p40_p7, %s579_s11, %s42_s18  }
  0x14   : > { %p669_p11 = por %p113_p10, %p55_p3  ;;  %s676_s25 = sand.u32 1, %s579_s11  }
  0x15   : > { %s362_s26 = sshll.u32 %s676_s25, 3  ;;  %s363_s27 = sshll.u32 %s587_s13, 7 }
  0x16   : > { %s839_s24 = scalar_select %p669_p11, 1, 0 }
  0x17   : > { %s685_s30 = scalar_lea.hbm %s831_s0, %s363_s27  ;;  %s137_s3 = scalar_lea.vmem [#allocation3], %s362_s26 }
  0x18   : > { %s145_s4 = sshll.u32 %s137_s3, 4  ;;  %p693_p0 = pnand %p391_p13, %p652_p4  ;;  %s689_s4 = int_to_ptr.vmem [resolvable:$true] %s145_s4 }
  0x19   : > { %s134_s6 = scalar_lea.sflag [#allocation4], %s676_s25  ;;  %s445_s7 = scalar_lea.hbm %s685_s30, 128 }
  0x1a   : > { %p446_p3 = scmp.ne.s32.totalorder %s685_s30, %s445_s7  ;;  %p447_p5 = pneg %p693_p0 }
  0x1b   : > { %s450_s16 = scalar_lea.hbm %s831_s0, 256  ;;  %p451_p4 = scmp.lt.u32.totalorder %s685_s30, %s831_s0 }
  0x1c   : > { %p448_p6 = pnand %p447_p5, %p446_p3  ;;  %p452_p10 = scmp.lt.u32.totalorder %s450_s16, %s445_s7 }
  0x1d   : > { %p454_p12 = scmp.lt.u32.totalorder %s445_s7, %s685_s30 }
  0x1e   : > { %p449_p7 = pneg %p448_p6  ;;  %p453_p13 = por %p452_p10, %p451_p4 }
  0x20   : > { %p455_p1 = por %p454_p12, %p453_p13 }
  0x22   : > { %p456_p2 = pnand %p455_p1, %p449_p7 }
  0x24   : > { %459 = shalt.err (!%p456_p2)
}
  0x25   : > { %s460_s20 = scalar_lea.vmem %s689_s4, 128  ;;  %s593_s28 = smov [#allocation3]  }
  0x26   : > { %p461_p3 = scmp.ne.s32.totalorder %s689_s4, %s460_s20  ;;  %s465_s29 = sshll.u32 %s593_s28, 4  ;;  %s466_s29 = int_to_ptr.vmem [resolvable:$false] %s465_s29 }
  0x27   : > { %s467_s3 = scalar_lea.vmem %s466_s29, 256  ;;  %p468_p9 = scmp.lt.s32.totalorder %s689_s4, %s466_s29 }
  0x28   : > { %p463_p6 = pnand %p461_p3, %p447_p5  ;;  %p469_p4 = scmp.lt.s32.totalorder %s467_s3, %s460_s20 }
  0x2a   : > { %p464_p11 = pneg %p463_p6  ;;  %p470_p10 = por %p469_p4, %p468_p9 }
  0x2c   : > { %p471_p12 = pnand %p470_p10, %p464_p11 }
  0x2e   : > { %474 = shalt.err (!%p471_p12)
}
  0x2f   : > { %383 = dma.hbm_to_vmem [thread:$0]  (!%p693_p0), %s685_s30, 128, %s689_s4, %s134_s6  }
  0x30   : > { %p841_p1 = scmp.lt.s32.totalorder %s591_s14, 3  ;;  %p842_p2 = scmp.ge.s32.totalorder %s591_s14, 1 }
  0x31   : > { %s738_s16 = scalar_lea.hbm %s832_s1, %s363_s27  ;;  %s156_s18 = scalar_lea.vmem [#allocation6], %s362_s26 }
  0x32   : > { %p729_p7 = pnand %p842_p2, %p841_p1  ;;  %s164_s19 = sshll.u32 %s156_s18, 4  ;;  %s165_s19 = int_to_ptr.vmem [resolvable:$true] %s164_s19 }
  0x33   : > { %s153_s30 = scalar_lea.sflag [#allocation7], %s676_s25  ;;  %s475_s4 = scalar_lea.hbm %s738_s16, 128 }
  0x34   : > { %s843_s7 = scalar_select %p729_p7, 1, 0 }
  0x35   : > { %p476_p9 = scmp.ne.s32.totalorder %s738_s16, %s475_s4  ;;  %s480_s27 = scalar_lea.hbm %s832_s1, 256 }
  0x36   : > { %p481_p3 = scmp.lt.u32.totalorder %s738_s16, %s832_s1  ;;  %p482_p6 = scmp.lt.u32.totalorder %s480_s27, %s475_s4 }
  0x37   : > { %p478_p11 = pnand %p476_p9, %p447_p5  ;;  %p484_p10 = scmp.lt.u32.totalorder %s475_s4, %s738_s16 }
  0x38   : > { %p483_p4 = por %p482_p6, %p481_p3 }
  0x39   : > { %p479_p13 = pneg %p478_p11 }
  0x3a   : > { %p485_p12 = por %p484_p10, %p483_p4 }
  0x3c   : > { %p486_p1 = pnand %p485_p12, %p479_p13 }
  0x3e   : > { %489 = shalt.err (!%p486_p1)
}
  0x3f   : > { %s490_s25 = scalar_lea.vmem %s165_s19, 128  ;;  %s594_s26 = smov [#allocation6]  }
  0x40   : > { %p491_p2 = scmp.ne.s32.totalorder %s165_s19, %s490_s25  ;;  %s495_s3 = sshll.u32 %s594_s26, 4  ;;  %s496_s3 = int_to_ptr.vmem [resolvable:$false] %s495_s3 }
  0x41   : > { %s497_s8 = scalar_lea.vmem %s496_s3, 256  ;;  %p498_p8 = scmp.lt.s32.totalorder %s165_s19, %s496_s3 }
  0x42   : > { %p493_p9 = pnand %p491_p2, %p447_p5  ;;  %p499_p7 = scmp.lt.s32.totalorder %s497_s8, %s490_s25 }
  0x44   : > { %p494_p11 = pneg %p493_p9  ;;  %p500_p3 = por %p499_p7, %p498_p8 }
  0x46   : > { %p501_p6 = pnand %p500_p3, %p494_p11 }
  0x48   : > { %504 = shalt.err (!%p501_p6)
}
  0x49   : > { %386 = dma.hbm_to_vmem [thread:$0]  (!%p693_p0), %s738_s16, 128, %s165_s19, %s153_s30  }
  0x4a   : > { %p844_p13 = scmp.ne.s32.totalorder %s843_s7, 0 }
  0x4b   : > { %s765_s15 = sand.u32 (!%p844_p13), 1, %s575_s10   ;;  %p845_p5 = scmp.ne.s32.totalorder (!%p844_p13), %s837_s21, 0 }
  0x4c   : > { %173 = sbr.rel (%p844_p13) target bundleno = 120 (0x78), region = 28  ;;  %s367_s18 = sshll.u32 (!%p844_p13), %s765_s15, 3 }
  0x4d   : > { %s176_s4 = scalar_lea.sflag (!%p844_p13), [#allocation4], %s765_s15  ;;  %s179_s6 = scalar_lea.vmem (!%p844_p13), [#allocation3], %s367_s18 }
  0x53   : > { %558 = dma.done.wait (%p845_p5), %s176_s4, 128  }
  0x54   : > { %560 = vsyncadd (%p845_p5), %s176_s4, 4294967168  ;;  %s185_s5 = scalar_lea.sflag [#allocation7], %s765_s15  ;;  %s188_s16 = scalar_lea.vmem [#allocation6], %s367_s18 }
  0x55   : > { %562 = dma.done.wait (%p845_p5), %s185_s5, 128  }
  0x56   : > { %564 = vsyncadd (%p845_p5), %s185_s5, 4294967168  ;;  %v221_v0 = vld [vmem:[%s179_s6] sm:$0xff]  ;;  %v222_v2 = vld [vmem:[%s188_s16] sm:$0xff]  ;;  %s213_s7 = scalar_lea.vmem [#allocation8], %s367_s18  ;;  %s371_s30 = sshll.u32 %s583_s12, 7 }
  0x57   : > { %441 = vlog2.f32 %v221_v0  ;;  %v227_v1 = vsub.f32 1.0, %v221_v0  ;;  %v226_v5 = vsub.f32 1.0, %v222_v2  ;;  %s255_s19 = sshll.u32 %s213_s7, 4  ;;  %s784_s27 = scalar_lea.hbm %s833_s2, %s371_s30  ;;  %s779_s19 = int_to_ptr.vmem [resolvable:$true] %s255_s19 }
  0x58   : > { %s242_s28 = scalar_lea.sflag [#allocation5], %s765_s15  ;;  %s505_s29 = scalar_lea.vmem %s779_s19, 128 }
  0x59   : > { %443 = vlog2.f32 %v227_v1  ;;  %p506_p8 = scmp.ne.s32.totalorder %s779_s19, %s505_s29  ;;  %p846_p0 = scmp.ne.s32.totalorder %s838_s22, 0 }
  0x5a   : > { %s595_s12 = smov [#allocation8]  }
  0x5b   : > { %p507_p7 = pnand %p506_p8, %p846_p0  ;;  %s509_s25 = sshll.u32 %s595_s12, 4  ;;  %s510_s25 = int_to_ptr.vmem [resolvable:$false] %s509_s25 }
  0x5c   : > { %s511_s26 = scalar_lea.vmem %s510_s25, 256  ;;  %p512_p10 = scmp.lt.s32.totalorder %s779_s19, %s510_s25 }
  0x5d   : > { %p508_p4 = pneg %p507_p7  ;;  %p513_p12 = scmp.lt.s32.totalorder %s511_s26, %s505_s29 }
  0x5f   : > { %p514_p1 = por %p513_p12, %p512_p10 }
  0x61   : > { %v442_v3 = vpop.eup %441  ;;  %p515_p2 = pnand %p514_p1, %p508_p4 }
  0x62   : > { %v224_v4 = vmul.f32 0.6931472, %v442_v3 }
  0x63   : > { %v444_v6 = vpop.eup %443 }
  0x64   : > { %v225_v7 = vmul.f32 %v224_v4, %v222_v2  ;;  %v229_v8 = vmul.f32 0.6931472, %v444_v6 }
  0x66   : > { %v230_v9 = vmul.f32 %v229_v8, %v226_v5 }
  0x68   : > { %v231_v10 = vadd.f32 %v230_v9, %v225_v7 }
  0x6a   : > { %240 = vst [vmem:[%s213_s7] sm:$0xff] %v231_v10 }
  0x6b   : > { %518 = shalt.err (!%p515_p2)
}
  0x6c   : > { %s519_s3 = scalar_lea.hbm %s784_s27, 128  ;;  %s523_s18 = scalar_lea.hbm %s833_s2, 256 }
  0x6d   : > { %p520_p9 = scmp.ne.s32.totalorder %s784_s27, %s519_s3  ;;  %p524_p6 = scmp.lt.u32.totalorder %s784_s27, %s833_s2 }
  0x6e   : > { %p525_p13 = scmp.lt.u32.totalorder %s523_s18, %s519_s3  ;;  %p527_p8 = scmp.lt.u32.totalorder %s519_s3, %s784_s27 }
  0x6f   : > { %p521_p11 = pnand %p520_p9, %p846_p0 }
  0x70   : > { %p526_p5 = por %p525_p13, %p524_p6 }
  0x71   : > { %p522_p3 = pneg %p521_p11 }
  0x72   : > { %p528_p7 = por %p527_p8, %p526_p5 }
  0x74   : > { %p529_p4 = pnand %p528_p7, %p522_p3 }
  0x76   : > { %532 = shalt.err (!%p529_p4)
}
  0x77   : > { %378 = dma.vmem_to_hbm [thread:$0]  (%p846_p0), %s779_s19, 128, %s784_s27, %s242_s28  }
  0x78 PF: > { %s267_s5 = sand.u32 1, %s571_s9   ;;  %p847_p10 = scmp.ne.s32.totalorder %s839_s24, 0 }
  0x79   : > { %p848_p12 = scmp.ge.s32.totalorder %s591_s14, 2  ;;  %s268_s16 = scalar_lea.sflag [#allocation5], %s267_s5 }
  0x7b   : > { %p388_p1 = pnand %p848_p12, %p847_p10 }
  0x7d   : > { %566 = dma.done.wait (!%p388_p1), %s268_s16, 128  }
  0x7e   : > { %568 = vsyncadd (!%p388_p1), %s268_s16, 4294967168  ;;  %s21_s14 = sadd.s32 1, %s591_s14   ;;  %s849_s9 = smov %s575_s10 }
  0x7f   : > { %p18_p2 = scmp.ge.s32.totalorder %s21_s14, 4   ;;  %s850_s10 = smov %s579_s11 }
  0x80   : > { %s851_s11 = smov %s667_s23  ;;  %s852_s12 = smov %s587_s13 }
  0x81   : > { %s853_s13 = smov %s855_s17  ;;  %20 = sbr.rel (!%p18_p2) target bundleno = 8 (0x8), region = 94 }
  0x88   :  { %273 = vsyncpa [#allocation4], 1 }
  0x89   :  { %275 = vsyncpa [#allocation4 + $0x1], 1 }
  0x8a   :  { %276 = vsyncpa [#allocation7], 1 }
  0x8b   :  { %278 = vsyncpa [#allocation7 + $0x1], 1 }
  0x8c   :  { %279 = vsyncpa [#allocation5], 1 }
  0x8d   :  { %281 = vsyncpa [#allocation5 + $0x1], 1 }

</bundles_post_ra>
